<compile_context>
chip_gen: v5e
topology: v5e:2x2
jax: 0.10.0
libtpu: 0.0.40
codegen_flags: <defaults>
</compile_context>

<pallas_src>
import functools
import math

import jax
import jax.numpy as jnp
from jax import lax
from jax.experimental import pallas as pl
from jax.experimental.pallas import tpu as pltpu


def _default_vmem_limit():
    # Generation-aware VMEM limit with headroom for Mosaic internal scratch.
    cap = 128 * 1024 * 1024
    try:
        info = pltpu.get_tpu_info()
        cap = int(getattr(info, "vmem_capacity_bytes", cap))
    except Exception:
        pass
    return max(32 * 1024 * 1024, min(100 * 1024 * 1024, cap - 16 * 1024 * 1024))


_VMEM_LIMIT = _default_vmem_limit()


def _cparams(*sem):
    return pltpu.CompilerParams(dimension_semantics=sem,
                                vmem_limit_bytes=_VMEM_LIMIT)


def _const_spec(shape):
    """Constant-index operand (weights/biases): single-buffered, loaded once."""
    zeros = (0,) * len(shape)
    return pl.BlockSpec(shape, lambda *_: zeros, pipeline_mode=pl.Buffered(1))


def _row_plan(n, max_tile=512):
    """Row tile + padded row count: big tiles, >=2 grid steps when possible."""
    if n >= 2 * max_tile:
        tile = max_tile
    else:
        half = max(-(-n // 2), 16)
        tile = -(-half // 16) * 16          # multiple of 16 (bf16 sublane tile)
    padded = -(-n // tile) * tile
    return tile, padded


def _pad_rows(x, padded):
    n = x.shape[0]
    if padded == n:
        return x
    return jnp.pad(x, ((0, padded - n), (0, 0)))


def _seq_tile(L, max_tile=256):
    if L <= max_tile:
        return L
    for t in (256, 128, 64, 32, 16):
        if L % t == 0:
            return t
    return L  # TODO(synk): pad L (q/kv/pos/mask) for awkward sequence lengths.


# ----------------------------------------------------------------------------
# Pallas kernels (fused stages)
# ----------------------------------------------------------------------------

def _ffn_kernel(x_ref, g_ref, b_ref, w1_ref, b1_ref, w2_ref, b2_ref, o_ref, *,
                scale):
    # LayerNorm -> Linear+swish -> Linear -> residual*scale, all on one tile.
    x = x_ref[...]
    mu = jnp.mean(x, axis=-1, keepdims=True)
    var = jnp.mean((x - mu) ** 2, axis=-1, keepdims=True)
    h = (x - mu) * lax.rsqrt(var + 1e-5) * g_ref[...] + b_ref[...]
    h1 = jnp.dot(h.astype(jnp.bfloat16), w1_ref[...],
                 preferred_element_type=jnp.float32) + b1_ref[...]
    h1 = h1 * jax.nn.sigmoid(h1)                       # swish (f32 on VPU/EUP)
    y = jnp.dot(h1.astype(jnp.bfloat16), w2_ref[...],
                preferred_element_type=jnp.float32) + b2_ref[...]
    o_ref[...] = x + scale * y


def _ffn_final_ln_kernel(x_ref, g_ref, b_ref, w1_ref, b1_ref, w2_ref, b2_ref,
                         gf_ref, bf_ref, o_ref, *, scale):
    # Same as _ffn_kernel, plus the per-layer final LayerNorm fused at the end.
    x = x_ref[...]
    mu = jnp.mean(x, axis=-1, keepdims=True)
    var = jnp.mean((x - mu) ** 2, axis=-1, keepdims=True)
    h = (x - mu) * lax.rsqrt(var + 1e-5) * g_ref[...] + b_ref[...]
    h1 = jnp.dot(h.astype(jnp.bfloat16), w1_ref[...],
                 preferred_element_type=jnp.float32) + b1_ref[...]
    h1 = h1 * jax.nn.sigmoid(h1)
    y = jnp.dot(h1.astype(jnp.bfloat16), w2_ref[...],
                preferred_element_type=jnp.float32) + b2_ref[...]
    y = x + scale * y
    mu2 = jnp.mean(y, axis=-1, keepdims=True)
    var2 = jnp.mean((y - mu2) ** 2, axis=-1, keepdims=True)
    o_ref[...] = (y - mu2) * lax.rsqrt(var2 + 1e-5) * gf_ref[...] + bf_ref[...]


def _ln_qkv_kernel(x_ref, g_ref, b_ref, w_ref, bias_ref, q_ref, k_ref, v_ref):
    # LayerNorm prologue + single fused (D, 3D) QKV matmul, split in-kernel.
    # q/k/v are written in bf16 (they are MXU operands downstream anyway).
    x = x_ref[...]
    mu = jnp.mean(x, axis=-1, keepdims=True)
    var = jnp.mean((x - mu) ** 2, axis=-1, keepdims=True)
    h = (x - mu) * lax.rsqrt(var + 1e-5) * g_ref[...] + b_ref[...]
    y = jnp.dot(h.astype(jnp.bfloat16), w_ref[...],
                preferred_element_type=jnp.float32) + bias_ref[...]
    D = q_ref.shape[-1]
    q_ref[...] = y[:, :D].astype(jnp.bfloat16)
    k_ref[...] = y[:, D:2 * D].astype(jnp.bfloat16)
    v_ref[...] = y[:, 2 * D:].astype(jnp.bfloat16)


def _linear_kernel(x_ref, w_ref, b_ref, o_ref):
    y = jnp.dot(x_ref[...].astype(jnp.bfloat16), w_ref[...],
                preferred_element_type=jnp.float32) + b_ref[...]
    o_ref[...] = y.astype(o_ref.dtype)


def _layernorm_kernel(x_ref, g_ref, b_ref, o_ref):
    x = x_ref[...]
    mu = jnp.mean(x, axis=-1, keepdims=True)
    var = jnp.mean((x - mu) ** 2, axis=-1, keepdims=True)
    o_ref[...] = (x - mu) * lax.rsqrt(var + 1e-5) * g_ref[...] + b_ref[...]


def _rel_attn_kernel(x_ref, q_ref, k_ref, v_ref, pos_ref, bu_ref, bv_ref,
                     m_ref, wo_ref, bo_ref, o_ref, *, scale):
    # One (batch, query-tile) per grid step.  Stacked-head formulation:
    # scores / softmax / PV run as batched (H, TQ, *) einsums (single fused
    # tensors, no per-head unrolled loop, no lane-axis concat).  The output
    # projection is a per-head batched matmul with wo reshaped (H, dk, D)
    # summed over heads, then residual add.  Output stays lane-dense (1,TQ,D).
    q = q_ref[0].astype(jnp.float32)                  # (H, TQ, dk)
    k = k_ref[0]                                      # (H, L, dk) bf16
    v = v_ref[0]                                      # (H, L, dk) bf16
    pe = pos_ref[...]                                 # (H, L, dk) bf16
    qu = (q + bu_ref[...]).astype(jnp.bfloat16)       # pos_bias_u
    qv = (q + bv_ref[...]).astype(jnp.bfloat16)       # pos_bias_v
    valid = m_ref[...] > 0                            # (1, 1, L) key mask
    # TODO(synk): pack heads so the dk-deep score contraction feeds the full
    # MXU depth; add flash-style KV-block tiling for long L (v7x 64 MiB VMEM).
    ac = jnp.einsum('hqd,hkd->hqk', qu, k, preferred_element_type=jnp.float32)
    bd = jnp.einsum('hqd,hkd->hqk', qv, pe, preferred_element_type=jnp.float32)
    # TODO(synk): assumes wenet-style length-L pos_emb with no rel_shift; the
    # ESPnet 2L-1 variant would need a different matrix_bd construction.
    s = (ac + bd) * scale                             # (H, TQ, L)
    s = jnp.where(valid, s, jnp.float32(-1e30))
    smax = jnp.max(s, axis=-1, keepdims=True)
    e = jnp.exp(s - smax)
    denom = jnp.sum(e, axis=-1, keepdims=True)
    p_attn = e * pl.reciprocal(denom, approx=True)    # divide on the EUP slot
    p_attn = jnp.where(valid, p_attn, jnp.float32(0.0))
    ctx = jnp.einsum('hqk,hkd->hqd', p_attn.astype(jnp.bfloat16), v,
                     preferred_element_type=jnp.float32)          # (H, TQ, dk)
    proj = jnp.einsum('hqc,hcd->hqd', ctx.astype(jnp.bfloat16), wo_ref[...],
                      preferred_element_type=jnp.float32)         # (H, TQ, D)
    out = jnp.sum(proj, axis=0) + bo_ref[...]                     # (TQ, D)
    o_ref[...] = (x_ref[0] + out)[None]


def _conv_module_kernel(x_ref, g_ref, b_ref, m_ref, pw1_ref, b1_ref,
                        dw_ref, dwb_ref, bns_ref, bnt_ref,
                        pw2_ref, b2_ref, o_ref, *, K):
    # Whole ConvolutionModule fused per batch:
    # LN -> mask -> pw1+GLU -> depthwise conv -> BN(eval)+swish -> pw2 -> mask
    # -> residual add.  Depthwise conv slides along L (non-causal padding).
    # TODO(synk): tile L with a (K-1)//2 halo for very long sequences (v7x),
    # and move the per-tap sublane shifts onto the XLU via pltpu.roll.
    x = x_ref[0]                          # (L, D) residual
    L, D = x.shape
    m = m_ref[0]                          # (L, 1) mask
    mu = jnp.mean(x, axis=-1, keepdims=True)
    var = jnp.mean((x - mu) ** 2, axis=-1, keepdims=True)
    h = (x - mu) * lax.rsqrt(var + 1e-5) * g_ref[...] + b_ref[...]
    # TODO(synk): openeat's exact ConvolutionModule mask handling unverified;
    # wenet-style masked_fill(~mask, 0) before/after the convs is used.
    h = h * m
    y = jnp.dot(h.astype(jnp.bfloat16), pw1_ref[...],
                preferred_element_type=jnp.float32) + b1_ref[...]
    g2 = y[:, :D] * jax.nn.sigmoid(y[:, D:])            # GLU over channels
    pad = (K - 1) // 2
    zp = jnp.zeros((pad, D), jnp.float32)
    gp = jnp.concatenate([zp, g2, zp], axis=0)          # (L + K - 1, D)
    w = dw_ref[...]                                     # (K, D), loaded once
    acc = jnp.zeros((L, D), jnp.float32)
    for kk in range(K):                                 # static -> unrolled
        acc = acc + gp[kk:kk + L, :] * w[kk:kk + 1, :]
    acc = acc + dwb_ref[...]
    acc = acc * bns_ref[...] + bnt_ref[...]             # BatchNorm1d (eval)
    acc = acc * jax.nn.sigmoid(acc)                     # swish
    y2 = jnp.dot(acc.astype(jnp.bfloat16), pw2_ref[...],
                 preferred_element_type=jnp.float32) + b2_ref[...]
    y2 = y2 * m
    o_ref[...] = (x + y2)[None]


# ----------------------------------------------------------------------------
# pallas_call wrappers
# ----------------------------------------------------------------------------

def ffn(x, g, b, w1, b1, w2, b2, *, scale):
    N, D = x.shape
    U = w1.shape[1]
    TN, Np = _row_plan(N)
    xp = _pad_rows(x, Np)
    out = pl.pallas_call(
        functools.partial(_ffn_kernel, scale=scale),
        out_shape=jax.ShapeDtypeStruct((Np, D), jnp.float32),
        grid=(Np // TN,),
        in_specs=[pl.BlockSpec((TN, D), lambda i: (i, 0)),
                  _const_spec((1, D)), _const_spec((1, D)),
                  _const_spec((D, U)), _const_spec((1, U)),
                  _const_spec((U, D)), _const_spec((1, D))],
        out_specs=pl.BlockSpec((TN, D), lambda i: (i, 0)),
        compiler_params=_cparams("parallel"),
    )(xp, g, b, w1, b1, w2, b2)
    return out if Np == N else out[:N]


def ffn_final(x, g, b, w1, b1, w2, b2, gf, bf, *, scale):
    N, D = x.shape
    U = w1.shape[1]
    TN, Np = _row_plan(N)
    xp = _pad_rows(x, Np)
    out = pl.pallas_call(
        functools.partial(_ffn_final_ln_kernel, scale=scale),
        out_shape=jax.ShapeDtypeStruct((Np, D), jnp.float32),
        grid=(Np // TN,),
        in_specs=[pl.BlockSpec((TN, D), lambda i: (i, 0)),
                  _const_spec((1, D)), _const_spec((1, D)),
                  _const_spec((D, U)), _const_spec((1, U)),
                  _const_spec((U, D)), _const_spec((1, D)),
                  _const_spec((1, D)), _const_spec((1, D))],
        out_specs=pl.BlockSpec((TN, D), lambda i: (i, 0)),
        compiler_params=_cparams("parallel"),
    )(xp, g, b, w1, b1, w2, b2, gf, bf)
    return out if Np == N else out[:N]


def ln_qkv(x, g, b, wqkv, bqkv, D):
    N = x.shape[0]
    TN, Np = _row_plan(N)
    xp = _pad_rows(x, Np)
    q, k, v = pl.pallas_call(
        _ln_qkv_kernel,
        out_shape=tuple(jax.ShapeDtypeStruct((Np, D), jnp.bfloat16)
                        for _ in range(3)),
        grid=(Np // TN,),
        in_specs=[pl.BlockSpec((TN, D), lambda i: (i, 0)),
                  _const_spec((1, D)), _const_spec((1, D)),
                  _const_spec((D, 3 * D)), _const_spec((1, 3 * D))],
        out_specs=tuple(pl.BlockSpec((TN, D), lambda i: (i, 0))
                        for _ in range(3)),
        compiler_params=_cparams("parallel"),
    )(xp, g, b, wqkv, bqkv)
    if Np != N:
        q, k, v = q[:N], k[:N], v[:N]
    return q, k, v


def linear(x, w, b, out_dtype=jnp.float32):
    N, Din = x.shape
    Dout = w.shape[1]
    TN, Np = _row_plan(N)
    xp = _pad_rows(x, Np)
    out = pl.pallas_call(
        _linear_kernel,
        out_shape=jax.ShapeDtypeStruct((Np, Dout), out_dtype),
        grid=(Np // TN,),
        in_specs=[pl.BlockSpec((TN, Din), lambda i: (i, 0)),
                  _const_spec((Din, Dout)), _const_spec((1, Dout))],
        out_specs=pl.BlockSpec((TN, Dout), lambda i: (i, 0)),
        compiler_params=_cparams("parallel"),
    )(xp, w, b)
    return out if Np == N else out[:N]


def layernorm(x, g, b):
    N, D = x.shape
    TN, Np = _row_plan(N)
    xp = _pad_rows(x, Np)
    out = pl.pallas_call(
        _layernorm_kernel,
        out_shape=jax.ShapeDtypeStruct((Np, D), jnp.float32),
        grid=(Np // TN,),
        in_specs=[pl.BlockSpec((TN, D), lambda i: (i, 0)),
                  _const_spec((1, D)), _const_spec((1, D))],
        out_specs=pl.BlockSpec((TN, D), lambda i: (i, 0)),
        compiler_params=_cparams("parallel"),
    )(xp, g, b)
    return out if Np == N else out[:N]


def rel_attention(x, qh, kh, vh, pos_hp, bias_u, bias_v, mask_f, wo3, bo):
    B, L, D = x.shape
    H, dk = qh.shape[1], qh.shape[3]
    TQ = _seq_tile(L)
    scale = 1.0 / math.sqrt(dk)
    res_spec = pl.BlockSpec((1, TQ, D), lambda b, i: (b, i, 0))
    return pl.pallas_call(
        functools.partial(_rel_attn_kernel, scale=scale),
        out_shape=jax.ShapeDtypeStruct((B, L, D), jnp.float32),
        grid=(B, L // TQ),
        in_specs=[res_spec,                                           # residual
                  pl.BlockSpec((1, H, TQ, dk), lambda b, i: (b, 0, i, 0)),
                  pl.BlockSpec((1, H, L, dk), lambda b, i: (b, 0, 0, 0)),
                  pl.BlockSpec((1, H, L, dk), lambda b, i: (b, 0, 0, 0)),
                  _const_spec((H, L, dk)),                            # pos
                  _const_spec((H, 1, dk)),                            # bias_u
                  _const_spec((H, 1, dk)),                            # bias_v
                  pl.BlockSpec((1, 1, L), lambda b, i: (b, 0, 0)),    # mask
                  _const_spec((H, dk, D)),                            # wo3
                  _const_spec((1, D))],                               # bo
        out_specs=res_spec,
        compiler_params=_cparams("parallel", "parallel"),
    )(x, qh, kh, vh, pos_hp, bias_u, bias_v, mask_f, wo3, bo)


def conv_module(x, g, b, mask_col, pw1_w, pw1_b, dw_w, dw_b,
                bn_scale, bn_shift, pw2_w, pw2_b, *, K):
    B, L, D = x.shape
    return pl.pallas_call(
        functools.partial(_conv_module_kernel, K=K),
        out_shape=jax.ShapeDtypeStruct((B, L, D), jnp.float32),
        grid=(B,),
        in_specs=[pl.BlockSpec((1, L, D), lambda bb: (bb, 0, 0)),
                  _const_spec((1, D)), _const_spec((1, D)),
                  pl.BlockSpec((1, L, 1), lambda bb: (bb, 0, 0)),
                  _const_spec((D, 2 * D)), _const_spec((1, 2 * D)),
                  _const_spec((K, D)), _const_spec((1, D)),
                  _const_spec((1, D)), _const_spec((1, D)),
                  _const_spec((D, D)), _const_spec((1, D))],
        out_specs=pl.BlockSpec((1, L, D), lambda bb: (bb, 0, 0)),
        compiler_params=_cparams("parallel"),
    )(x, g, b, mask_col, pw1_w, pw1_b, dw_w, dw_b,
      bn_scale, bn_shift, pw2_w, pw2_b)


# ----------------------------------------------------------------------------
# Encoder forward (glue in plain JAX, compute in fused Pallas kernels above)
# ----------------------------------------------------------------------------

def encoder_layer(x, mask_f, mask_col, pos_hp, p, B, L, D, H, K):
    N = B * L
    dk = D // H
    ff_scale = 0.5  # macaron style

    # --- macaron feed-forward (LN + FF + residual*0.5 fused; dropout = id) ---
    x = ffn(x, p["ln_ffm_g"], p["ln_ffm_b"], p["ffm_w1"], p["ffm_b1"],
            p["ffm_w2"], p["ffm_b2"], scale=ff_scale)

    # --- relative-position multi-headed self-attention ---
    q, k, v = ln_qkv(x, p["ln_mha_g"], p["ln_mha_b"], p["wqkv"], p["bqkv"], D)

    def heads(t):  # (N, D) bf16 -> (B, H, L, dk) bf16 (cheap XLA transpose)
        return jnp.transpose(t.reshape(B, L, H, dk), (0, 2, 1, 3))

    x3 = rel_attention(x.reshape(B, L, D), heads(q), heads(k), heads(v),
                       pos_hp, p["pos_u"], p["pos_v"], mask_f,
                       p["wo3"], p["bo"])

    # --- convolution module (fully fused, residual included) ---
    x3 = conv_module(x3, p["ln_conv_g"], p["ln_conv_b"], mask_col,
                     p["pw1_w"], p["pw1_b"], p["dw_w"], p["dw_b"],
                     p["bn_scale"], p["bn_shift"], p["pw2_w"], p["pw2_b"], K=K)
    x = x3.reshape(N, D)

    # --- second feed-forward + per-layer final LayerNorm (fused) ---
    x = ffn_final(x, p["ln_ff_g"], p["ln_ff_b"], p["ff_w1"], p["ff_b1"],
                  p["ff_w2"], p["ff_b2"], p["ln_final_g"], p["ln_final_b"],
                  scale=ff_scale)
    return x


def prepare_layer_params(p, H):
    """Fuse QKV, reshape wo/pos biases head-major, pre-cast weights to bf16."""
    D = p["wq"].shape[0]
    dk = D // H
    bf = lambda w: w.astype(jnp.bfloat16)
    row = lambda v: v.reshape(1, -1)
    return dict(
        ln_ffm_g=row(p["ln_ffm_g"]), ln_ffm_b=row(p["ln_ffm_b"]),
        ffm_w1=bf(p["ffm_w1"]), ffm_b1=row(p["ffm_b1"]),
        ffm_w2=bf(p["ffm_w2"]), ffm_b2=row(p["ffm_b2"]),
        ln_mha_g=row(p["ln_mha_g"]), ln_mha_b=row(p["ln_mha_b"]),
        wqkv=bf(jnp.concatenate([p["wq"], p["wk"], p["wv"]], axis=1)),
        bqkv=row(jnp.concatenate([p["bq"], p["bk"], p["bv"]])),
        wpos=bf(p["wpos"]),
        pos_u=p["pos_u"].reshape(H, 1, dk).astype(jnp.float32),
        pos_v=p["pos_v"].reshape(H, 1, dk).astype(jnp.float32),
        wo3=bf(p["wo"].reshape(H, dk, D)), bo=row(p["bo"]),
        ln_conv_g=row(p["ln_conv_g"]), ln_conv_b=row(p["ln_conv_b"]),
        pw1_w=bf(p["pw1_w"]), pw1_b=row(p["pw1_b"]),
        dw_w=p["dw_w"], dw_b=row(p["dw_b"]),
        bn_scale=row(p["bn_scale"]), bn_shift=row(p["bn_shift"]),
        pw2_w=bf(p["pw2_w"]), pw2_b=row(p["pw2_b"]),
        ln_ff_g=row(p["ln_ff_g"]), ln_ff_b=row(p["ln_ff_b"]),
        ff_w1=bf(p["ff_w1"]), ff_b1=row(p["ff_b1"]),
        ff_w2=bf(p["ff_w2"]), ff_b2=row(p["ff_b2"]),
        ln_final_g=row(p["ln_final_g"]), ln_final_b=row(p["ln_final_b"]),
    )


def encoder_forward(xs, masks, pos_emb, layers, after_g, after_b, *, H, K,
                    num_blocks_share=1):
    B, L, D = xs.shape
    dk = D // H
    mask_f = masks.astype(jnp.float32)              # (B, 1, L) key mask
    mask_col = jnp.transpose(mask_f, (0, 2, 1))     # (B, L, 1) frame mask
    pos_flat = pos_emb.reshape(-1, D)               # (L, D)
    zero_b = jnp.zeros((1, D), jnp.float32)
    params = [prepare_layer_params(p, H) for p in layers]
    x = xs.reshape(B * L, D)
    for p in params:
        # pos projection hoisted out of the shared-block inner loop, bf16.
        pos_p = linear(pos_flat, p["wpos"], zero_b, out_dtype=jnp.bfloat16)
        pos_hp = jnp.transpose(pos_p.reshape(L, H, dk), (1, 0, 2))  # (H,L,dk)
        for _ in range(num_blocks_share):
            x = encoder_layer(x, mask_f, mask_col, pos_hp, p, B, L, D, H, K)
    x = layernorm(x, after_g.reshape(1, -1), after_b.reshape(1, -1))
    return x.reshape(B, L, D), masks, pos_emb


# ----------------------------------------------------------------------------
# Deterministic parameter init + example inputs
# ----------------------------------------------------------------------------

def init_layer_params(key, D, H, U, K):
    dk = D // H
    ks = jax.random.split(key, 14)
    s = 0.1

    def w(k, shape):
        return s * jax.random.normal(k, shape, jnp.float32)

    ones = jnp.ones((D,), jnp.float32)
    zeros = jnp.zeros((D,), jnp.float32)
    return dict(
        ln_ffm_g=ones, ln_ffm_b=zeros,
        ffm_w1=w(ks[0], (D, U)), ffm_b1=jnp.zeros((U,), jnp.float32),
        ffm_w2=w(ks[1], (U, D)), ffm_b2=zeros,
        ln_mha_g=ones, ln_mha_b=zeros,
        wq=w(ks[2], (D, D)), bq=zeros,
        wk=w(ks[3], (D, D)), bk=zeros,
        wv=w(ks[4], (D, D)), bv=zeros,
        wo=w(ks[5], (D, D)), bo=zeros,
        wpos=w(ks[6], (D, D)),
        pos_u=w(ks[7], (H, dk)), pos_v=w(ks[8], (H, dk)),
        ln_conv_g=ones, ln_conv_b=zeros,
        pw1_w=w(ks[9], (D, 2 * D)), pw1_b=jnp.zeros((2 * D,), jnp.float32),
        dw_w=w(ks[10], (K, D)), dw_b=zeros,
        # BatchNorm1d eval with default stats: scale = 1/sqrt(1+eps), shift = 0
        # TODO(synk): real checkpoints must fold running_mean/var into these.
        bn_scale=jnp.full((D,), 1.0 / math.sqrt(1.0 + 1e-5), jnp.float32),
        bn_shift=zeros,
        pw2_w=w(ks[11], (D, D)), pw2_b=zeros,
        ln_ff_g=ones, ln_ff_b=zeros,
        ff_w1=w(ks[12], (D, U)), ff_b1=jnp.zeros((U,), jnp.float32),
        ff_w2=w(ks[13], (U, D)), ff_b2=zeros,
        ln_final_g=ones, ln_final_b=zeros,
    )


def sinusoidal_pos_emb(L, D):
    pos = jnp.arange(L, dtype=jnp.float32)[:, None]
    div = jnp.exp(jnp.arange(0, D, 2, dtype=jnp.float32)
                  * (-math.log(10000.0) / D))
    pe = jnp.zeros((L, D), jnp.float32)
    pe = pe.at[:, 0::2].set(jnp.sin(pos * div))
    pe = pe.at[:, 1::2].set(jnp.cos(pos * div))
    return pe[None]                          # (1, L, D)


if __name__ == "__main__":
    B, L = 2, 16
    D, H, U, K = 32, 4, 64, 15               # d_model, heads, linear_units, cnn kernel
    NUM_BLOCKS, NUM_BLOCKS_SHARE = 2, 1

    key = jax.random.PRNGKey(0)
    kx, kp = jax.random.split(key)
    xs = jax.random.normal(kx, (B, L, D), jnp.float32)
    masks = jnp.ones((B, 1, L), dtype=jnp.bool_)
    pos_emb = sinusoidal_pos_emb(L, D)

    layer_keys = jax.random.split(kp, NUM_BLOCKS // NUM_BLOCKS_SHARE)
    layers = [init_layer_params(k, D, H, U, K) for k in layer_keys]
    after_g = jnp.ones((D,), jnp.float32)
    after_b = jnp.zeros((D,), jnp.float32)

    out, out_masks, out_pos = encoder_forward(
        xs, masks, pos_emb, layers, after_g, after_b,
        H=H, K=K, num_blocks_share=NUM_BLOCKS_SHARE)
    jax.block_until_ready(out)
    assert out.shape == (B, L, D) and out.dtype == jnp.float32
    assert bool(jnp.all(jnp.isfinite(out)))
    print("KERNEL_OK")
</pallas_src>

<mosaic_0001>
module attributes {stable_mosaic.version = 11 : i64} {
  func.func @_linear_kernel(%arg0: i32, %arg1: memref<16x32xf32, #tpu.memory_space<vmem>>, %arg2: memref<32x32xbf16, #tpu.memory_space<vmem>>, %arg3: memref<1x32xf32, #tpu.memory_space<vmem>>, %arg4: memref<16x32xbf16, #tpu.memory_space<vmem>>) attributes {dimension_semantics = [#tpu.dimension_semantics<parallel>], iteration_bounds = array<i64: 1>, scalar_prefetch = 0 : i64, scratch_operands = 0 : i64, tpu.core_type = #tpu.core_type<tc>, window_params = [{transform_indices = @transform_0, window_bounds = array<i64: 16, 32>}, {pipeline_mode = #tpu.pipeline_mode<synchronous>, transform_indices = @transform_1, window_bounds = array<i64: 32, 32>}, {pipeline_mode = #tpu.pipeline_mode<synchronous>, transform_indices = @transform_2, window_bounds = array<i64: 1, 32>}, {transform_indices = @transform_3, window_bounds = array<i64: 16, 32>}]} {
    %c0 = arith.constant 0 : index
    %c0_0 = arith.constant 0 : index
    %0 = vector.load %arg1[%c0, %c0_0] : memref<16x32xf32, #tpu.memory_space<vmem>>, vector<16x32xf32>
    %1 = arith.truncf %0 : vector<16x32xf32> to vector<16x32xbf16>
    %c0_1 = arith.constant 0 : index
    %c0_2 = arith.constant 0 : index
    %2 = vector.load %arg2[%c0_1, %c0_2] : memref<32x32xbf16, #tpu.memory_space<vmem>>, vector<32x32xbf16>
    %cst = arith.constant dense<0.000000e+00> : vector<16x32xf32>
    %3 = tpu.matmul %1, %2, %cst {dimension_numbers = #tpu.dot_dimension_numbers<[1], [0], [0], [1], [0, 0, 1, 1], [], []>} : vector<16x32xbf16>, vector<32x32xbf16>, vector<16x32xf32> -> vector<16x32xf32>
    %c0_3 = arith.constant 0 : index
    %c0_4 = arith.constant 0 : index
    %4 = vector.load %arg3[%c0_3, %c0_4] : memref<1x32xf32, #tpu.memory_space<vmem>>, vector<1x32xf32>
    %5 = vector.broadcast %4 : vector<1x32xf32> to vector<16x32xf32>
    %6 = arith.addf %3, %5 : vector<16x32xf32>
    %7 = arith.truncf %6 : vector<16x32xf32> to vector<16x32xbf16>
    %c0_5 = arith.constant 0 : index
    %c0_6 = arith.constant 0 : index
    %8 = vector.load %arg4[%c0_5, %c0_6] : memref<16x32xbf16, #tpu.memory_space<vmem>>, vector<16x32xbf16>
    tpu.vector_store %arg4[%c0_5, %c0_6], %7 {strides = array<i32>} : memref<16x32xbf16, #tpu.memory_space<vmem>>, vector<16x32xbf16>,
    return
  }
  func.func @transform_0(%arg0: i32) -> (i32, i32) {
    %c0_i32 = arith.constant 0 : i32
    %c0_i32_0 = arith.constant 0 : i32
    return %arg0, %c0_i32 : i32, i32
  }
  func.func @transform_1(%arg0: i32) -> (i32, i32) {
    %c0_i32 = arith.constant 0 : i32
    %c0_i32_0 = arith.constant 0 : i32
    %c0_i32_1 = arith.constant 0 : i32
    return %c0_i32, %c0_i32_0 : i32, i32
  }
  func.func @transform_2(%arg0: i32) -> (i32, i32) {
    %c0_i32 = arith.constant 0 : i32
    %c0_i32_0 = arith.constant 0 : i32
    %c0_i32_1 = arith.constant 0 : i32
    return %c0_i32, %c0_i32_0 : i32, i32
  }
  func.func @transform_3(%arg0: i32) -> (i32, i32) {
    %c0_i32 = arith.constant 0 : i32
    %c0_i32_0 = arith.constant 0 : i32
    return %arg0, %c0_i32 : i32, i32
  }
}

</mosaic_0001>

<bundles_post_ra>
// kernel: tpu_custom_call.1
= control target key start
LH: loop header
LB: loop body
LE: loop exit
PB: predicated region body
PF: predicated region fallthrough
CT: control target
= control target key end

     0   :  { %8 = vsyncpa [#allocation3], 0  ;;  %s256_s0 = inlined_call_operand.hbm [shape: f32[16,32], index: 0, kind: input, shape index: {}]   ;;  %s257_s1 = inlined_call_operand.hbm [shape: bf16[32,32], index: 1, kind: input, shape index: {}]   ;;  %s258_s2 = inlined_call_operand.vmem [shape: f32[1,32], index: 2, kind: input, shape index: {}]   ;;  %s259_s3 = inlined_call_operand.hbm [shape: bf16[16,32], index: 3, kind: output, shape index: {}]  }
   0x1   :  { %9 = vsyncpa [#allocation6], 0 }
   0x2   :  { %10 = vsyncpa [#allocation4], 0  ;;  %s15_s14 = sshll.u32 %s256_s0, 4  ;;  %s211_s15 = smov [#allocation2]   ;;  %s16_s14 = int_to_ptr.hbm [resolvable:$true] %s15_s14 }
   0x3   :  { %s17_s16 = sshll.u32 %s211_s15, 4  ;;  %s28_s19 = sshll.u32 %s257_s1, 4  ;;  %s18_s16 = int_to_ptr.vmem [resolvable:$true] %s17_s16  ;;  %s29_s19 = int_to_ptr.hbm [resolvable:$true] %s28_s19 }
   0x4   :  { %s212_s20 = smov 128   ;;  %s213_s21 = smov 8  }
   0x5   :  { %23 = dma.hbm_to_vmem [thread:$0]  %s16_s14, 256, %s18_s16, [#allocation3], %s212_s20, %s212_s20, %s213_s21  }
   0x6   :  { %s214_s22 = smov [#allocation5]   ;;  %s215_s24 = smov 64  }
   0x7   :  { %s30_s23 = sshll.u32 %s214_s22, 4  ;;  %s216_s25 = smov 4   ;;  %s31_s23 = int_to_ptr.vmem [resolvable:$true] %s30_s23 }
   0x8   :  { %36 = dma.hbm_to_vmem [thread:$0]  %s29_s19, 256, %s31_s23, [#allocation6], %s215_s24, %s215_s24, %s216_s25  }
   0x9   :  { %205 = dma.done.wait [#allocation3], 256  }
   0xa   :  { %206 = vsyncadd [#allocation3], 4294967040 }
   0xb   :  { %207 = dma.done.wait [#allocation6], 256  }
   0xc   :  { %208 = vsyncadd [#allocation6], 4294967040  ;;  %v124_v0 = vld [vmem:[#allocation5 + $0x8] sm:$0xff]  ;;  %v123_v1 = vld [vmem:[#allocation5] sm:$0xff]  ;;  %vm71_vm0 = vcmask 261120   ;;  %vm91_vm1 = vcmask 257024  }
   0xd   :  { %81 = vmatpush.bf16.msra.mxu0 %v124_v0  ;;  %v48_v2 = vld [vmem:[#allocation2] sm:$0xff]  ;;  %v49_v3 = vld [vmem:[#allocation2 + $0x8] sm:$0xff]  ;;  %s217_s26 = smov [#allocation7]   ;;  %s100_s30 = sshll.u32 %s259_s3, 4  ;;  %s101_s30 = int_to_ptr.hbm [resolvable:$true] %s100_s30 }
   0xe   :  { %v50_v4 = vpack.c.bf16 %v49_v3, %v48_v2  ;;  %v132_v5 = vld [vmem:[%s258_s2] ss:$0 sm:$0xff]  ;;  %s98_s27 = sshll.u32 %s217_s26, 4  ;;  %s99_s27 = int_to_ptr.vmem [resolvable:$true] %s98_s27 }
  0x11   :  { %82 = vmatpush.bf16.msra.mxu0 %v123_v1 }
  0x14   :  { %122 = vmatmul.msk.bf16.vlgmr.msra.gmra.mxu0 %vm71_vm0, %v50_v4 }
  0x91   :  { %v84_v6 = vpop.f32.mrf.mxu0 }
  0x92   :  { %v85_v7 = vadd.f32 %v132_v5, %v84_v6 }
  0x94   :  { %v89_v8 = vpack.c.bf16 %v85_v7, %v85_v7 }
  0x96   :  { %92 = vst.msk [vmem:[#allocation7] sm:$0xf] %vm91_vm1, %v89_v8 }
  0x99   :  { %v86_v9 = vpop.f32.mrf.mxu0 }
  0x9a   :  { %v87_v10 = vadd.f32 %v132_v5, %v86_v9 }
  0x9c   :  { %v90_v11 = vpack.c.bf16 %v87_v10, %v87_v10 }
  0x9e   :  { %93 = vst.msk [vmem:[#allocation7 + $0x4] sm:$0xf] %vm91_vm1, %v90_v11 }
  0x9f   :  { %106 = dma.vmem_to_hbm [thread:$0]  %s99_s27, 128, %s101_s30, [#allocation4], %s215_s24, %s215_s24, %s216_s25  }
  0xa0   :  { %209 = dma.done.wait [#allocation4], 128  }
  0xa1   :  { %210 = vsyncadd [#allocation4], 4294967168 }
  0xa2   :  { %111 = vsyncpa [#allocation3], 1 }
  0xa3   :  { %112 = vsyncpa [#allocation6], 1 }
  0xa4   :  { %113 = vsyncpa [#allocation4], 1 }

</bundles_post_ra>
